<compile_context>
chip_gen: v5e
topology: v5e:2x2
jax: 0.10.0
libtpu: 0.0.40
codegen_flags: <defaults>
</compile_context>

<pallas_src>
import functools

import jax
import jax.numpy as jnp
from jax.experimental import pallas as pl
from jax.experimental.pallas import tpu as pltpu


def _round_up(x: int, m: int) -> int:
    return (x + m - 1) // m * m


def _patch_proj_kernel(x_ref, w_ref, b_ref, o_ref):
    # x_ref: [TILE_M, K]      packed patch features for TILE_M tokens
    # w_ref: [K, TILE_D]      pre-transposed Linear weight tile (lane-padded)
    # b_ref: [1, TILE_D]
    # o_ref: [TILE_M, TILE_D]
    acc = jnp.dot(x_ref[...], w_ref[...], preferred_element_type=jnp.float32)
    o_ref[...] = (acc + b_ref[...]).astype(o_ref.dtype)


def _choose_tile_d(Dp: int, K: int, itemsize: int, budget: int = 12 << 20) -> int:
    """Largest multiple-of-128 output tile dividing Dp whose (double-buffered)
    resident weight block fits `budget` (keeps large K*D inside v7x VMEM)."""
    max_d = max(128, (budget // max(1, 2 * K * itemsize)) // 128 * 128)
    if Dp <= max_d:
        return Dp
    for cand in range(min(max_d, Dp) // 128 * 128, 127, -128):
        if Dp % cand == 0:
            return cand
    return 128


def _choose_tile_m(M: int, K: int, tile_d: int, itemsize: int,
                   max_tile: int = 1024, vmem_budget: int = 24 << 20) -> int:
    """Pick the token tile: multiple of 8, fits the VMEM budget (double-buffered
    activation + output blocks), >= 2 grid steps when M allows (both v7x
    TensorCores busy), and prefers an exact divisor of M (no padding copy)."""
    kp = max(_round_up(K, 128), 128)          # lane-padded activation block width
    per_tok = 2 * (kp + tile_d) * itemsize    # bytes per token, double-buffered
    cap = max(8, (vmem_budget // per_tok) // 8 * 8)
    upper = min(max_tile, cap)
    m8 = _round_up(M, 8)
    if m8 <= upper:
        if M < 16:                            # too small to split usefully
            return m8
        upper = min(upper, _round_up(pl.cdiv(M, 2), 8))   # force >= 2 steps
    upper = max(8, (upper // 8) * 8)
    for cand in range(upper, 7, -8):          # prefer an exact divisor of M
        if M % cand == 0:
            return cand
    return upper


@functools.partial(
    jax.jit, static_argnames=("spatial_patch_size", "temporal_patch_size")
)
def patch_embed_forward(x, w_kd, b, *, spatial_patch_size, temporal_patch_size):
    """Pallas implementation of CleanPatchEmbed.forward.

    x:    [B, C, T, H, W]
    w_kd: [K, D]  pre-transposed nn.Linear weight, K = C*r*m*n
                  (feature packing order (c, r, m, n), matching einops)
    b:    [D]
    Returns [B, T//r, H//m, W//n, D].
    """
    B, C, T, H, W = x.shape
    r = temporal_patch_size
    m = spatial_patch_size
    n = spatial_patch_size
    assert T % r == 0 and H % m == 0 and W % n == 0
    t, h, w = T // r, H // m, W // n

    K, D = w_kd.shape
    assert K == C * r * m * n
    assert b.shape == (D,)

    # ---- rearrange 'b c (t r) (h m) (w n) -> b t h w (c r m n)' ------------
    # Layout-only; XLA may fuse this producer straight into the pallas_call's
    # activation operand (allow_input_fusion below) instead of a separate HBM
    # round trip.
    x6 = x.reshape(B, C, t, r, h, m, w, n)
    x6 = jnp.transpose(x6, (0, 2, 4, 6, 1, 3, 5, 7))  # b t h w c r m n
    M = B * t * h * w
    patches = x6.reshape(M, K)

    # ---- tile / pad sizes ---------------------------------------------------
    act_itemsize = jnp.dtype(x.dtype).itemsize
    w_itemsize = jnp.dtype(w_kd.dtype).itemsize
    Dp = _round_up(D, 128)                       # lane-dense (unmasked) stores
    tile_d = _choose_tile_d(Dp, K, w_itemsize)
    tile_m = _choose_tile_m(M, K, tile_d, act_itemsize)
    Mp = _round_up(M, tile_m)

    if Mp != M:
        patches = jnp.pad(patches, ((0, Mp - M), (0, 0)))
    if Dp != D:
        w_kd = jnp.pad(w_kd, ((0, 0), (0, Dp - D)))
        b = jnp.pad(b, (0, Dp - D))
    b2 = b.reshape(1, Dp)

    grid = (Mp // tile_m, Dp // tile_d)          # j (D tiles) is the inner axis

    cost = pl.CostEstimate(
        flops=2 * M * K * D,
        transcendentals=0,
        bytes_accessed=(
            Mp * K * act_itemsize                       # activations in
            + grid[0] * K * Dp * w_itemsize             # weight (refetched per i if D tiled)
            + Dp * jnp.dtype(b.dtype).itemsize
            + Mp * Dp * act_itemsize                    # activations out
        ),
    )

    # Conservative double-buffered VMEM working-set estimate -> explicit limit.
    kp = max(_round_up(K, 128), 128)
    vmem_need = (
        2 * tile_m * kp * act_itemsize               # activation blocks
        + 2 * tile_m * tile_d * act_itemsize         # output blocks
        + 2 * _round_up(K, 8) * tile_d * w_itemsize  # weight blocks
        + 2 * 8 * tile_d * jnp.dtype(b.dtype).itemsize
    )
    vmem_limit = int(min(max(int(vmem_need * 1.5) + (4 << 20), 32 << 20), 64 << 20))

    out = pl.pallas_call(
        _patch_proj_kernel,
        out_shape=jax.ShapeDtypeStruct((Mp, Dp), x.dtype),
        grid_spec=pltpu.PrefetchScalarGridSpec(
            num_scalar_prefetch=0,
            grid=grid,
            in_specs=[
                # Activation tiles stream over the token axis (i); their block
                # index is constant in j, so Pallas elides re-copies while
                # sweeping output-feature tiles.
                pl.BlockSpec((tile_m, K), lambda i, j: (i, 0)),
                # Weight / bias tiles depend only on j; with a single D tile
                # (the common patch-embed case) they are DMA'd exactly once
                # and stay VMEM-resident across the whole grid.
                pl.BlockSpec((K, tile_d), lambda i, j: (0, j)),
                pl.BlockSpec((1, tile_d), lambda i, j: (0, j)),
            ],
            out_specs=pl.BlockSpec((tile_m, tile_d), lambda i, j: (i, j)),
        ),
        compiler_params=pltpu.CompilerParams(
            dimension_semantics=("parallel", "parallel"),
            # Fuse the rearrange (transpose) producer into the activation
            # operand instead of materializing a second slab in HBM.
            allow_input_fusion=[True, False, False],
            vmem_limit_bytes=vmem_limit,
        ),
        cost_estimate=cost,
    )(patches, w_kd, b2)

    out = out[:M, :D].reshape(B, t, h, w, D)
    return out


def _reference(x, w_dk, b, r, m, n):
    """Pure-JAX reference matching the PyTorch module (weight in [D, K] layout)."""
    B, C, T, H, W = x.shape
    t, h, w = T // r, H // m, W // n
    x6 = x.reshape(B, C, t, r, h, m, w, n)
    x6 = jnp.transpose(x6, (0, 2, 4, 6, 1, 3, 5, 7))
    patches = x6.reshape(B, t, h, w, C * r * m * n)
    return patches @ w_dk.T + b


if __name__ == "__main__":
    key = jax.random.PRNGKey(0)
    k_x, k_w, k_b = jax.random.split(key, 3)

    # Small shapes consistent with the module.
    B, C, T, H, W = 2, 4, 4, 16, 16
    spatial_patch_size = 2
    temporal_patch_size = 2
    out_channels = 128  # multiple of 128 -> lane-dense output, no padding needed

    K = C * temporal_patch_size * spatial_patch_size * spatial_patch_size  # 32

    x = jax.random.normal(k_x, (B, C, T, H, W), dtype=jnp.float32)

    # nn.Linear-style uniform init, PyTorch layout [out_channels, K].
    bound = 1.0 / (K ** 0.5)
    w_dk = jax.random.uniform(
        k_w, (out_channels, K), minval=-bound, maxval=bound, dtype=jnp.float32
    )
    b = jax.random.uniform(
        k_b, (out_channels,), minval=-bound, maxval=bound, dtype=jnp.float32
    )

    # Weight transpose hoisted out of the per-call hot path (param-init time).
    w_kd = jnp.asarray(w_dk.T)  # [K, out_channels]

    out = patch_embed_forward(
        x,
        w_kd,
        b,
        spatial_patch_size=spatial_patch_size,
        temporal_patch_size=temporal_patch_size,
    )
    out = jax.block_until_ready(out)

    ref = _reference(
        x, w_dk, b, temporal_patch_size, spatial_patch_size, spatial_patch_size
    )
    assert out.shape == (
        B,
        T // temporal_patch_size,
        H // spatial_patch_size,
        W // spatial_patch_size,
        out_channels,
    )
    assert jnp.allclose(out, ref, atol=1e-5, rtol=1e-5)

    print("KERNEL_OK")
</pallas_src>

<mosaic_0001>
module attributes {stable_mosaic.version = 11 : i64} {
  func.func @_patch_proj_kernel(%arg0: i32, %arg1: i32, %arg2: memref<128x32xf32, #tpu.memory_space<vmem>>, %arg3: memref<32x128xf32, #tpu.memory_space<vmem>>, %arg4: memref<1x128xf32, #tpu.memory_space<vmem>>, %arg5: memref<128x128xf32, #tpu.memory_space<vmem>>) attributes {dimension_semantics = [#tpu.dimension_semantics<parallel>, #tpu.dimension_semantics<parallel>], iteration_bounds = array<i64: 2, 1>, scalar_prefetch = 0 : i64, scratch_operands = 0 : i64, tpu.core_type = #tpu.core_type<tc>, window_params = [{transform_indices = @transform_0, window_bounds = array<i64: 128, 32>}, {transform_indices = @transform_1, window_bounds = array<i64: 32, 128>}, {transform_indices = @transform_2, window_bounds = array<i64: 1, 128>}, {transform_indices = @transform_3, window_bounds = array<i64: 128, 128>}]} {
    %c0 = arith.constant 0 : index
    %c0_0 = arith.constant 0 : index
    %0 = vector.load %arg2[%c0, %c0_0] : memref<128x32xf32, #tpu.memory_space<vmem>>, vector<128x32xf32>
    %c0_1 = arith.constant 0 : index
    %c0_2 = arith.constant 0 : index
    %1 = vector.load %arg3[%c0_1, %c0_2] : memref<32x128xf32, #tpu.memory_space<vmem>>, vector<32x128xf32>
    %cst = arith.constant dense<0.000000e+00> : vector<128x128xf32>
    %2 = tpu.matmul %0, %1, %cst {dimension_numbers = #tpu.dot_dimension_numbers<[1], [0], [0], [1], [0, 0, 1, 1], [], []>} : vector<128x32xf32>, vector<32x128xf32>, vector<128x128xf32> -> vector<128x128xf32>
    %c0_3 = arith.constant 0 : index
    %c0_4 = arith.constant 0 : index
    %3 = vector.load %arg4[%c0_3, %c0_4] : memref<1x128xf32, #tpu.memory_space<vmem>>, vector<1x128xf32>
    %4 = vector.broadcast %3 : vector<1x128xf32> to vector<128x128xf32>
    %5 = arith.addf %2, %4 : vector<128x128xf32>
    %c0_5 = arith.constant 0 : index
    %c0_6 = arith.constant 0 : index
    %6 = vector.load %arg5[%c0_5, %c0_6] : memref<128x128xf32, #tpu.memory_space<vmem>>, vector<128x128xf32>
    tpu.vector_store %arg5[%c0_5, %c0_6], %5 {strides = array<i32>} : memref<128x128xf32, #tpu.memory_space<vmem>>, vector<128x128xf32>,
    return
  }
  func.func @transform_0(%arg0: i32, %arg1: i32) -> (i32, i32) {
    %c0_i32 = arith.constant 0 : i32
    %c0_i32_0 = arith.constant 0 : i32
    return %arg0, %c0_i32 : i32, i32
  }
  func.func @transform_1(%arg0: i32, %arg1: i32) -> (i32, i32) {
    %c0_i32 = arith.constant 0 : i32
    %c0_i32_0 = arith.constant 0 : i32
    return %c0_i32, %arg1 : i32, i32
  }
  func.func @transform_2(%arg0: i32, %arg1: i32) -> (i32, i32) {
    %c0_i32 = arith.constant 0 : i32
    %c0_i32_0 = arith.constant 0 : i32
    return %c0_i32, %arg1 : i32, i32
  }
  func.func @transform_3(%arg0: i32, %arg1: i32) -> (i32, i32) {
    %c0_i32 = arith.constant 0 : i32
    return %arg0, %arg1 : i32, i32
  }
}

</mosaic_0001>

<bundles_post_ra>
// kernel: patch_embed_forward.1
= control target key start
LH: loop header
LB: loop body
LE: loop exit
PB: predicated region body
PF: predicated region fallthrough
CT: control target
= control target key end

     0   :  { %8 = vsyncpa [#allocation3], 0  ;;  %s859_s0 = inlined_call_operand.vmem [shape: f32[256,32], index: 0, kind: input, shape index: {}]   ;;  %s860_s1 = inlined_call_operand.vmem [shape: f32[32,128], index: 1, kind: input, shape index: {}]   ;;  %s861_s2 = inlined_call_operand.vmem [shape: f32[1,128], index: 2, kind: input, shape index: {}]   ;;  %s862_s3 = inlined_call_operand.hbm [shape: f32[256,128], index: 3, kind: output, shape index: {}]  }
   0x1   :  { %10 = vsyncpa [#allocation3 + $0x1], 0  ;;  %s691_s12 = smov 0   ;;  %s693_s13 = smov 0  }
   0x2   :  { %s695_s14 = smov 0   ;;  %s697_s15 = smov 0  }
   0x3   :  { %s699_s16 = smov 0   ;;  %s701_s17 = smov 0  }
   0x4 LB: > { %s487_s18 = sadd.s32 4294967295, %s667_s17   ;;  %s488_s19 = sadd.s32 4294967294, %s667_s17   ;;  %s667_s17 = sphi %s701_s17, %s16_s17   ;;  %s663_s16 = sphi %s699_s16, %s869_s16   ;;  %s659_s15 = sphi %s697_s15, %s868_s15   ;;  %s655_s14 = sphi %s695_s14, %s867_s14   ;;  %s651_s13 = sphi %s693_s13, %s866_s13   ;;  %s647_s12 = sphi %s691_s12, %s865_s12  }
   0x5   : > { %s28_s20 = sadd.s32 1, %s663_s16  ;;  %s115_s21 = sadd.s32 1, %s655_s14 }
   0x6   : > { %p30_p0 = scmp.ge.s32.totalorder %s28_s20, 2  ;;  %p125_p1 = scmp.ne.s32.totalorder %s655_s14, %s651_s13 }
   0x7   : > { %p126_p2 = scmp.eq.s32.totalorder %s487_s18, 1  ;;  %p131_p3 = scmp.ne.s32.totalorder %s651_s13, %s647_s12 }
   0x8   : > { %s871_s20 = smov (%p30_p0, %s28_s20), 0  ;;  %p132_p5 = scmp.eq.s32.totalorder %s488_s19, 1 }
   0x9   : > { %p731_p4 = por %p126_p2, %p125_p1  ;;  %s110_s23 = ssub.s32 %s663_s16, %s871_s20 }
   0xa   : > { %p493_p6 = scmp.ge.s32.totalorder %s667_s17, 1  ;;  %p113_p7 = scmp.eq.s32.totalorder %s110_s23, 0 }
   0xb   : > { %p738_p8 = por %p132_p5, %p131_p3  ;;  %p172_p9 = scmp.lt.s32.totalorder %s667_s17, 3 }
   0xc   : > { %s744_s25 = scalar_select %p113_p7, %s655_s14, %s115_s21  }
   0xd   : > { %p173_p10 = pnand %p493_p6, %p172_p9 }
   0xe   : > { %s495_s30 = sshll.u32 (!%p173_p10), %s659_s15, 4  ;;  %s200_s18 = sand.u32 (!%p173_p10), 1, %s651_s13  }
   0xf   : > { %176 = sbr.rel (%p173_p10) target bundleno = 191 (0xbf), region = 32  ;;  %p204_p11 = scmp.lt.s32.totalorder (!%p173_p10), %s495_s30, 31 }
  0x10   : > { %s494_s19 = sshll.u32 (!%p173_p10), %s200_s18, 7  ;;  %s518_s27 = sshll.u32 (!%p173_p10), %s659_s15, 7 }
  0x11   : > { %s802_s26 = scalar_lea.vmem (!%p173_p10), [#allocation2], %s494_s19  ;;  %s372_s15 = scalar_lea.sflag (!%p173_p10), [#allocation3], %s200_s18 }
  0x12   : > { %s385_s4 = sshll.u32 (!%p173_p10), %s802_s26, 4  ;;  %s609_s10 = scalar_lea.hbm (!%p173_p10), %s862_s3, 256  ;;  %s386_s4 = int_to_ptr.vmem [resolvable:$true] %s385_s4 }
  0x14   : > { %v236_v0 = vld [vmem:[%s860_s1 + $0x18] sm:$0xff]  ;;  %v235_v1 = vld [vmem:[%s860_s1 + $0x10] sm:$0xff]  ;;  %v234_v2 = vld [vmem:[%s860_s1 + $0x8] sm:$0xff]  ;;  %s873_s30 = smov (!%p204_p11, %s495_s30), 31  ;;  %vm241_vm0 = vcmask 261120  }
  0x15   : > { %520 = vmatpush.msra.mxu2 %v236_v0  ;;  %521 = vmatpush.msra.mxu3 %v236_v0  ;;  %v233_v3 = vld [vmem:[%s860_s1] sm:$0xff]  ;;  %s496_s8 = sshll.u32 %s873_s30, 3  ;;  %s384_s30 = scalar_lea.hbm %s862_s3, %s518_s27 }
  0x16   : > { %302 = vmatpush.msra.mxu0 %v236_v0  ;;  %519 = vmatpush.msra.mxu1 %v236_v0  ;;  %s762_s11 = scalar_lea.vmem %s859_s0, %s496_s8  ;;  %v588_v20 = vld [vmem:[%s861_s2] ss:$0 sm:$0xff]  ;;  %s387_s5 = sshll.u32 %s384_s30, 4  ;;  %s388_s5 = int_to_ptr.hbm [resolvable:$true] %s387_s5 }
  0x17   : > { %523 = vmatpush.msra.mxu2 %v235_v1  ;;  %524 = vmatpush.msra.mxu3 %v235_v1  ;;  %v225_v4 = vld [vmem:[%s762_s11 + $0x40] sm:$0xff]  ;;  %v226_v8 = vld [vmem:[%s762_s11 + $0x48] sm:$0xff]  ;;  %v227_v12 = vld [vmem:[%s762_s11 + $0x50] sm:$0xff]  ;;  %s603_s6 = sshra.s32 %s388_s5, 4  ;;  %s604_s6 = int_to_ptr.hbm [resolvable:$true] %s603_s6 }
  0x18   : > { %303 = vmatpush.msra.mxu0 %v235_v1  ;;  %522 = vmatpush.msra.mxu1 %v235_v1  ;;  %v229_v5 = vld [vmem:[%s762_s11 + $0x60] sm:$0xff]  ;;  %v230_v9 = vld [vmem:[%s762_s11 + $0x68] sm:$0xff]  ;;  %v231_v13 = vld [vmem:[%s762_s11 + $0x70] sm:$0xff]  ;;  %s605_s7 = scalar_lea.hbm %s604_s6, 128  ;;  %p610_p1 = scmp.lt.s32.totalorder %s604_s6, %s862_s3 }
  0x19   : > { %526 = vmatpush.msra.mxu2 %v234_v2  ;;  %527 = vmatpush.msra.mxu3 %v234_v2  ;;  %v217_v6 = vld [vmem:[%s762_s11] sm:$0xff]  ;;  %v218_v10 = vld [vmem:[%s762_s11 + $0x8] sm:$0xff]  ;;  %v219_v14 = vld [vmem:[%s762_s11 + $0x10] sm:$0xff]  ;;  %p606_p12 = scmp.ne.s32.totalorder %s604_s6, %s605_s7  ;;  %p611_p2 = scmp.lt.s32.totalorder %s609_s10, %s605_s7 }
  0x1a   : > { %304 = vmatpush.msra.mxu0 %v234_v2  ;;  %525 = vmatpush.msra.mxu1 %v234_v2  ;;  %v221_v7 = vld [vmem:[%s762_s11 + $0x20] sm:$0xff]  ;;  %v222_v11 = vld [vmem:[%s762_s11 + $0x28] sm:$0xff]  ;;  %v223_v15 = vld [vmem:[%s762_s11 + $0x30] sm:$0xff] }
  0x1b   : > { %529 = vmatpush.msra.mxu2 %v233_v3  ;;  %530 = vmatpush.msra.mxu3 %v233_v3  ;;  %v228_v16 = vld [vmem:[%s762_s11 + $0x58] sm:$0xff]  ;;  %p607_p13 = pnand %p606_p12, %p731_p4  ;;  %p612_p3 = por %p611_p2, %p610_p1 }
  0x1c   : > { %505 = vmatmul.msk.f32.vlgmr.msra.gmra.mxu2 %vm241_vm0, %v225_v4  ;;  %509 = vmatmul.msk.f32.vlgmr.msra.gmra.mxu3 %vm241_vm0, %v229_v5  ;;  %v232_v17 = vld [vmem:[%s762_s11 + $0x78] sm:$0xff] }
  0x1d   : > { %305 = vmatpush.msra.mxu0 %v233_v3  ;;  %528 = vmatpush.msra.mxu1 %v233_v3  ;;  %v220_v18 = vld [vmem:[%s762_s11 + $0x18] sm:$0xff]  ;;  %p608_p0 = pneg %p607_p13 }
  0x1e   : > { %497 = vmatmul.msk.f32.vlgmr.msra.gmra.mxu0 %vm241_vm0, %v217_v6  ;;  %501 = vmatmul.msk.f32.vlgmr.msra.gmra.mxu1 %vm241_vm0, %v221_v7  ;;  %v224_v19 = vld [vmem:[%s762_s11 + $0x38] sm:$0xff] }
  0x1f   : > { %p613_p5 = pnand %p612_p3, %p608_p0 }
  0x24   : > { %506 = vmatmul.msk.f32.gmra.mxu2 %vm241_vm0, %v226_v8  ;;  %510 = vmatmul.msk.f32.gmra.mxu3 %vm241_vm0, %v230_v9 }
  0x26   : > { %498 = vmatmul.msk.f32.gmra.mxu0 %vm241_vm0, %v218_v10  ;;  %502 = vmatmul.msk.f32.gmra.mxu1 %vm241_vm0, %v222_v11 }
  0x2c   : > { %507 = vmatmul.msk.f32.gmra.mxu2 %vm241_vm0, %v227_v12  ;;  %511 = vmatmul.msk.f32.gmra.mxu3 %vm241_vm0, %v231_v13 }
  0x2e   : > { %499 = vmatmul.msk.f32.gmra.mxu0 %vm241_vm0, %v219_v14  ;;  %503 = vmatmul.msk.f32.gmra.mxu1 %vm241_vm0, %v223_v15 }
  0x34   : > { %508 = vmatmul.msk.f32.gmra.mxu2 %vm241_vm0, %v228_v16  ;;  %512 = vmatmul.msk.f32.gmra.mxu3 %vm241_vm0, %v232_v17 }
  0x36   : > { %500 = vmatmul.msk.f32.gmra.mxu0 %vm241_vm0, %v220_v18  ;;  %504 = vmatmul.msk.f32.gmra.mxu1 %vm241_vm0, %v224_v19 }
  0x9b   : > { %v307_v21 = vpop.f32.mrf.mxu0  ;;  %v319_v22 = vpop.f32.mrf.mxu1 }
  0x9c   : > { %v308_v23 = vadd.f32 %v588_v20, %v307_v21  ;;  %v320_v24 = vadd.f32 %v588_v20, %v319_v22 }
  0x9e   : > { %355 = vst [vmem:[%s802_s26] sm:$0xff] %v308_v23 }
  0x9f   : > { %359 = vst [vmem:[%s802_s26 + $0x20] sm:$0xff] %v320_v24  ;;  %v331_v25 = vpop.f32.mrf.mxu2  ;;  %v343_v26 = vpop.f32.mrf.mxu3 }
  0xa0   : > { %v332_v27 = vadd.f32 %v588_v20, %v331_v25  ;;  %v344_v28 = vadd.f32 %v588_v20, %v343_v26 }
  0xa2   : > { %363 = vst [vmem:[%s802_s26 + $0x40] sm:$0xff] %v332_v27 }
  0xa3   : > { %367 = vst [vmem:[%s802_s26 + $0x60] sm:$0xff] %v344_v28  ;;  %v310_v29 = vpop.f32.mrf.mxu0  ;;  %v322_v30 = vpop.f32.mrf.mxu1 }
  0xa4   : > { %v311_v31 = vadd.f32 %v588_v20, %v310_v29  ;;  %v323_v32 = vadd.f32 %v588_v20, %v322_v30 }
  0xa6   : > { %356 = vst [vmem:[%s802_s26 + $0x8] sm:$0xff] %v311_v31 }
  0xa7   : > { %360 = vst [vmem:[%s802_s26 + $0x28] sm:$0xff] %v323_v32  ;;  %v334_v33 = vpop.f32.mrf.mxu2  ;;  %v346_v34 = vpop.f32.mrf.mxu3 }
  0xa8   : > { %v335_v35 = vadd.f32 %v588_v20, %v334_v33  ;;  %v347_v36 = vadd.f32 %v588_v20, %v346_v34 }
  0xaa   : > { %364 = vst [vmem:[%s802_s26 + $0x48] sm:$0xff] %v335_v35 }
  0xab   : > { %368 = vst [vmem:[%s802_s26 + $0x68] sm:$0xff] %v347_v36  ;;  %v313_v37 = vpop.f32.mrf.mxu0  ;;  %v325_v38 = vpop.f32.mrf.mxu1 }
  0xac   : > { %v314_v39 = vadd.f32 %v588_v20, %v313_v37  ;;  %v326_v40 = vadd.f32 %v588_v20, %v325_v38 }
  0xae   : > { %357 = vst [vmem:[%s802_s26 + $0x10] sm:$0xff] %v314_v39 }
  0xaf   : > { %361 = vst [vmem:[%s802_s26 + $0x30] sm:$0xff] %v326_v40  ;;  %v337_v41 = vpop.f32.mrf.mxu2  ;;  %v349_v42 = vpop.f32.mrf.mxu3 }
  0xb0   : > { %v338_v43 = vadd.f32 %v588_v20, %v337_v41  ;;  %v350_v44 = vadd.f32 %v588_v20, %v349_v42 }
  0xb2   : > { %365 = vst [vmem:[%s802_s26 + $0x50] sm:$0xff] %v338_v43 }
  0xb3   : > { %369 = vst [vmem:[%s802_s26 + $0x70] sm:$0xff] %v350_v44  ;;  %v316_v45 = vpop.f32.mrf.mxu0  ;;  %v328_v46 = vpop.f32.mrf.mxu1 }
  0xb4   : > { %v317_v47 = vadd.f32 %v588_v20, %v316_v45  ;;  %v329_v48 = vadd.f32 %v588_v20, %v328_v46 }
  0xb6   : > { %358 = vst [vmem:[%s802_s26 + $0x18] sm:$0xff] %v317_v47 }
  0xb7   : > { %362 = vst [vmem:[%s802_s26 + $0x38] sm:$0xff] %v329_v48  ;;  %v340_v49 = vpop.f32.mrf.mxu2  ;;  %v352_v50 = vpop.f32.mrf.mxu3 }
  0xb8   : > { %v341_v51 = vadd.f32 %v588_v20, %v340_v49  ;;  %v353_v52 = vadd.f32 %v588_v20, %v352_v50 }
  0xba   : > { %366 = vst [vmem:[%s802_s26 + $0x58] sm:$0xff] %v341_v51 }
  0xbb   : > { %370 = vst [vmem:[%s802_s26 + $0x78] sm:$0xff] %v353_v52 }
  0xbc   : > { %616 = shalt.err (!%p613_p5)
}
  0xbd   : > { %s669_s18 = smov 128   ;;  %s670_s21 = smov 8  }
  0xbe   : > { %531 = dma.vmem_to_hbm [thread:$0]  (%p731_p4), %s386_s4, 2048, %s388_s5, %s372_s15, %s669_s18, %s669_s18, %s670_s21  }
  0xbf PF: > { %p537_p6 = scmp.ge.s32.totalorder %s667_s17, 2  ;;  %s402_s23 = sand.u32 1, %s647_s12  }
  0xc0   : > { %s403_s26 = scalar_lea.sflag [#allocation3], %s402_s23 }
  0xc1   : > { %p534_p7 = pnand %p537_p6, %p738_p8 }
  0xc3   : > { %p535_p9 = pneg %p534_p7 }
  0xc5   : > { %642 = dma.done.wait (%p535_p9), %s403_s26, 2048  }
  0xc6   : > { %644 = vsyncadd (%p535_p9), %s403_s26, 4294965248  ;;  %s16_s17 = sadd.s32 1, %s667_s17   ;;  %s865_s12 = smov %s651_s13 }
  0xc7   : > { %p13_p10 = scmp.ge.s32.totalorder %s16_s17, 4   ;;  %s866_s13 = smov %s655_s14 }
  0xc8   : > { %s867_s14 = smov %s744_s25  ;;  %s868_s15 = smov %s663_s16 }
  0xc9   : > { %s869_s16 = smov %s871_s20  ;;  %15 = sbr.rel (!%p13_p10) target bundleno = 4 (0x4), region = 73 }
  0xce   :  { %409 = vsyncpa [#allocation3], 1 }
  0xcf   :  { %411 = vsyncpa [#allocation3 + $0x1], 1 }

</bundles_post_ra>
